<compile_context>
chip_gen: v5e
topology: v5e:2x2
jax: 0.10.0
libtpu: 0.0.40
codegen_flags: <defaults>
</compile_context>

<pallas_src>
import functools

import jax
import jax.numpy as jnp
from jax.experimental import pallas as pl
from jax.experimental.pallas import tpu as pltpu


def _round_up(x, m):
    return (x + m - 1) // m * m


def _attention_kernel(hid_ref, enc_ref, wh_ref, we_ref, b_ref, v_ref, out_ref):
    # hid_ref : (TB, D)      bf16   decoder hidden (batch tile)
    # enc_ref : (TB, S, E)   bf16   encoder outputs (batch tile, full src_len)
    # wh_ref  : (D, D)       bf16   hidden  -> dec_hid projection (VMEM-resident)
    # we_ref  : (E, D)       bf16   encoder -> dec_hid projection (VMEM-resident)
    # b_ref   : (1, D)       f32    attn bias
    # v_ref   : (1, D)       f32    scoring vector
    # out_ref : (TB, S)      f32    softmax attention weights
    TB, D = hid_ref.shape
    _, S, E = enc_ref.shape

    hid = hid_ref[...]                                   # (TB, D)
    enc = enc_ref[...].reshape(TB * S, E)                # (TB*S, E) - sublane merge only

    # concat([hidden, enc]) @ W.T == hid @ W_h + enc @ W_e  (bf16 MXU, f32 accumulation)
    # Bias folded into the small (TB, D) tensor before the (TB, S, D) broadcast.
    h_proj = jnp.dot(hid, wh_ref[...], preferred_element_type=jnp.float32) + b_ref[...]
    e_proj = jnp.dot(enc, we_ref[...], preferred_element_type=jnp.float32)   # (TB*S, D)

    energy = jnp.tanh(e_proj.reshape(TB, S, D) + h_proj[:, None, :])         # (TB, S, D) f32

    # v-projection (Linear(D, 1, bias=False)) as VPU multiply + lane reduce.
    scores = jnp.sum(energy * v_ref[...][None, :, :], axis=-1)               # (TB, S)

    # Numerically-stable softmax over src_len (dim=1); exact division keeps rows
    # summing to 1 within f32 rounding.
    m = jnp.max(scores, axis=1, keepdims=True)
    ex = jnp.exp(scores - m)
    out_ref[...] = (ex / jnp.sum(ex, axis=1, keepdims=True)).astype(out_ref.dtype)


def prepare_attention_params(attn_w, attn_b, v_w):
    """Run ONCE per model (outside any decode-timestep loop).

    attn_w: (D, E + D)  torch Linear weight layout (concat order = [hidden, enc_out])
    attn_b: (D,)
    v_w:    (1, D)
    """
    D = attn_b.shape[0]
    W_t = attn_w.T                                   # (D + E, D)
    W_h = W_t[:D, :].astype(jnp.bfloat16)            # (D, D)
    W_e = W_t[D:, :].astype(jnp.bfloat16)            # (E, D)
    b2 = attn_b.reshape(1, D).astype(jnp.float32)    # (1, D)
    v2 = v_w.reshape(1, D).astype(jnp.float32)       # (1, D)
    return W_h, W_e, b2, v2


@functools.partial(jax.jit, static_argnames=("block_b",))
def attention_forward(hidden, encoder_outputs, W_h, W_e, b2, v2, *, block_b=128):
    """
    hidden:          (B, dec_hid_dim)
    encoder_outputs: (B, src_len, enc_hid_dim)
    W_h/W_e/b2/v2:   from prepare_attention_params()
    returns:         (B, src_len) softmax attention weights, f32
    """
    B, D = hidden.shape
    _, S, E = encoder_outputs.shape

    # Batch tile: multiple of 16 (bf16 sublane packing), capped at block_b (block_b
    # itself must be a multiple of 16). Pad B so the grid divides evenly; padded rows
    # are independent (per-row softmax) and sliced off below.
    tile_b = min(block_b, _round_up(B, 16))
    B_pad = _round_up(B, tile_b)
    if B_pad != B:
        hidden = jnp.pad(hidden, ((0, B_pad - B), (0, 0)))
        encoder_outputs = jnp.pad(encoder_outputs, ((0, B_pad - B), (0, 0), (0, 0)))

    hid_bf = hidden.astype(jnp.bfloat16)
    enc_bf = encoder_outputs.astype(jnp.bfloat16)

    grid = (B_pad // tile_b,)

    out = pl.pallas_call(
        _attention_kernel,
        out_shape=jax.ShapeDtypeStruct((B_pad, S), jnp.float32),
        grid=grid,
        in_specs=[
            pl.BlockSpec((tile_b, D), lambda i: (i, 0)),        # hidden tile
            pl.BlockSpec((tile_b, S, E), lambda i: (i, 0, 0)),  # encoder tile (full S)
            pl.BlockSpec((D, D), lambda i: (0, 0)),             # W_h  (resident)
            pl.BlockSpec((E, D), lambda i: (0, 0)),             # W_e  (resident)
            pl.BlockSpec((1, D), lambda i: (0, 0)),             # bias (resident)
            pl.BlockSpec((1, D), lambda i: (0, 0)),             # v    (resident)
        ],
        out_specs=pl.BlockSpec((tile_b, S), lambda i: (i, 0)),
        compiler_params=pltpu.CompilerParams(
            dimension_semantics=("parallel",),                  # megacore on v7x
        ),
    )(hid_bf, enc_bf, W_h, W_e, b2, v2)

    return out[:B]


def attention_ref(hidden, encoder_outputs, attn_w, attn_b, v_w):
    """Pure-JAX f32 reference mirroring the torch forward."""
    B, S, E = encoder_outputs.shape
    D = hidden.shape[-1]
    hid_rep = jnp.broadcast_to(hidden[:, None, :], (B, S, D))
    cat = jnp.concatenate([hid_rep, encoder_outputs], axis=-1)      # (B, S, D+E)
    energy = jnp.tanh(cat @ attn_w.T + attn_b)                      # (B, S, D)
    attention = (energy @ v_w.T)[..., 0]                            # (B, S)
    return jax.nn.softmax(attention, axis=1)


if __name__ == "__main__":
    # Small, deterministic configuration.
    B = 2            # batch
    S = 8            # src_len
    ENC_HID = 32     # enc_hid_dim
    DEC_HID = 32     # dec_hid_dim

    key = jax.random.PRNGKey(0)
    k_hid, k_enc, k_w, k_b, k_v = jax.random.split(key, 5)

    hidden = jax.random.normal(k_hid, (B, DEC_HID), dtype=jnp.float32)
    encoder_outputs = jax.random.normal(k_enc, (B, S, ENC_HID), dtype=jnp.float32)

    # Deterministic parameter init mimicking torch Linear default (uniform +-1/sqrt(fan_in)).
    fan_attn = ENC_HID + DEC_HID
    attn_w = jax.random.uniform(
        k_w, (DEC_HID, fan_attn), jnp.float32,
        minval=-1.0 / jnp.sqrt(fan_attn), maxval=1.0 / jnp.sqrt(fan_attn))
    attn_b = jax.random.uniform(
        k_b, (DEC_HID,), jnp.float32,
        minval=-1.0 / jnp.sqrt(fan_attn), maxval=1.0 / jnp.sqrt(fan_attn))
    v_w = jax.random.uniform(
        k_v, (1, DEC_HID), jnp.float32,
        minval=-1.0 / jnp.sqrt(DEC_HID), maxval=1.0 / jnp.sqrt(DEC_HID))

    # Hoisted once (per-model, not per decode step).
    W_h, W_e, b2, v2 = prepare_attention_params(attn_w, attn_b, v_w)

    out = attention_forward(hidden, encoder_outputs, W_h, W_e, b2, v2)
    out = jax.block_until_ready(out)

    ref = attention_ref(hidden, encoder_outputs, attn_w, attn_b, v_w)
    assert out.shape == (B, S)
    # bf16 matmul operands (f32 accumulation) -> loosen tolerance vs the f32 reference.
    assert jnp.allclose(out, ref, atol=2e-2, rtol=2e-2), "Pallas kernel mismatch vs reference"
    assert jnp.allclose(jnp.sum(out, axis=1), 1.0, atol=1e-5), "softmax rows must sum to 1"

    print("KERNEL_OK")
</pallas_src>

<mosaic_0001>
module attributes {stable_mosaic.version = 11 : i64} {
  func.func @_attention_kernel(%arg0: i32, %arg1: memref<16x32xbf16, #tpu.memory_space<vmem>>, %arg2: memref<16x8x32xbf16, #tpu.memory_space<vmem>>, %arg3: memref<32x32xbf16, #tpu.memory_space<vmem>>, %arg4: memref<32x32xbf16, #tpu.memory_space<vmem>>, %arg5: memref<1x32xf32, #tpu.memory_space<vmem>>, %arg6: memref<1x32xf32, #tpu.memory_space<vmem>>, %arg7: memref<16x8xf32, #tpu.memory_space<vmem>>) attributes {dimension_semantics = [#tpu.dimension_semantics<parallel>], iteration_bounds = array<i64: 1>, scalar_prefetch = 0 : i64, scratch_operands = 0 : i64, tpu.core_type = #tpu.core_type<tc>, window_params = [{transform_indices = @transform_0, window_bounds = array<i64: 16, 32>}, {transform_indices = @transform_1, window_bounds = array<i64: 16, 8, 32>}, {pipeline_mode = #tpu.pipeline_mode<synchronous>, transform_indices = @transform_2, window_bounds = array<i64: 32, 32>}, {pipeline_mode = #tpu.pipeline_mode<synchronous>, transform_indices = @transform_3, window_bounds = array<i64: 32, 32>}, {pipeline_mode = #tpu.pipeline_mode<synchronous>, transform_indices = @transform_4, window_bounds = array<i64: 1, 32>}, {pipeline_mode = #tpu.pipeline_mode<synchronous>, transform_indices = @transform_5, window_bounds = array<i64: 1, 32>}, {transform_indices = @transform_6, window_bounds = array<i64: 16, 8>}]} {
    %c0 = arith.constant 0 : index
    %c0_0 = arith.constant 0 : index
    %0 = vector.load %arg1[%c0, %c0_0] : memref<16x32xbf16, #tpu.memory_space<vmem>>, vector<16x32xbf16>
    %c0_1 = arith.constant 0 : index
    %c0_2 = arith.constant 0 : index
    %c0_3 = arith.constant 0 : index
    %1 = vector.load %arg2[%c0_1, %c0_2, %c0_3] : memref<16x8x32xbf16, #tpu.memory_space<vmem>>, vector<16x8x32xbf16>
    %2 = vector.shape_cast %1 : vector<16x8x32xbf16> to vector<128x32xbf16>
    %c0_4 = arith.constant 0 : index
    %c0_5 = arith.constant 0 : index
    %3 = vector.load %arg3[%c0_4, %c0_5] : memref<32x32xbf16, #tpu.memory_space<vmem>>, vector<32x32xbf16>
    %cst = arith.constant dense<0.000000e+00> : vector<16x32xf32>
    %4 = tpu.matmul %0, %3, %cst {dimension_numbers = #tpu.dot_dimension_numbers<[1], [0], [0], [1], [0, 0, 1, 1], [], []>} : vector<16x32xbf16>, vector<32x32xbf16>, vector<16x32xf32> -> vector<16x32xf32>
    %c0_6 = arith.constant 0 : index
    %c0_7 = arith.constant 0 : index
    %5 = vector.load %arg5[%c0_6, %c0_7] : memref<1x32xf32, #tpu.memory_space<vmem>>, vector<1x32xf32>
    %6 = vector.broadcast %5 : vector<1x32xf32> to vector<16x32xf32>
    %7 = arith.addf %4, %6 : vector<16x32xf32>
    %c0_8 = arith.constant 0 : index
    %c0_9 = arith.constant 0 : index
    %8 = vector.load %arg4[%c0_8, %c0_9] : memref<32x32xbf16, #tpu.memory_space<vmem>>, vector<32x32xbf16>
    %cst_10 = arith.constant dense<0.000000e+00> : vector<128x32xf32>
    %9 = tpu.matmul %2, %8, %cst_10 {dimension_numbers = #tpu.dot_dimension_numbers<[1], [0], [0], [1], [0, 0, 1, 1], [], []>} : vector<128x32xbf16>, vector<32x32xbf16>, vector<128x32xf32> -> vector<128x32xf32>
    %10 = vector.shape_cast %9 : vector<128x32xf32> to vector<16x8x32xf32>
    %11 = vector.shape_cast %7 : vector<16x32xf32> to vector<16x1x32xf32>
    %12 = vector.broadcast %11 : vector<16x1x32xf32> to vector<16x8x32xf32>
    %13 = arith.addf %10, %12 : vector<16x8x32xf32>
    %14 = math.tanh %13 : vector<16x8x32xf32>
    %c0_11 = arith.constant 0 : index
    %c0_12 = arith.constant 0 : index
    %15 = vector.load %arg6[%c0_11, %c0_12] : memref<1x32xf32, #tpu.memory_space<vmem>>, vector<1x32xf32>
    %16 = vector.shape_cast %15 : vector<1x32xf32> to vector<1x1x32xf32>
    %17 = vector.broadcast %16 : vector<1x1x32xf32> to vector<16x8x32xf32>
    %18 = arith.mulf %14, %17 : vector<16x8x32xf32>
    %cst_13 = arith.constant dense<0.000000e+00> : vector<16x8xf32>
    %19 = vector.multi_reduction <add>, %18, %cst_13 [2] : vector<16x8x32xf32> to vector<16x8xf32>
    %cst_14 = arith.constant dense<0xFF800000> : vector<16xf32>
    %20 = vector.multi_reduction <maximumf>, %19, %cst_14 [1] : vector<16x8xf32> to vector<16xf32>
    %21 = vector.shape_cast %20 : vector<16xf32> to vector<16x1xf32>
    %22 = vector.broadcast %21 : vector<16x1xf32> to vector<16x8xf32>
    %23 = arith.subf %19, %22 : vector<16x8xf32>
    %24 = math.exp %23 : vector<16x8xf32>
    %cst_15 = arith.constant dense<0.000000e+00> : vector<16xf32>
    %25 = vector.multi_reduction <add>, %24, %cst_15 [1] : vector<16x8xf32> to vector<16xf32>
    %26 = vector.shape_cast %25 : vector<16xf32> to vector<16x1xf32>
    %27 = vector.broadcast %26 : vector<16x1xf32> to vector<16x8xf32>
    %28 = arith.divf %24, %27 : vector<16x8xf32>
    %c0_16 = arith.constant 0 : index
    %c0_17 = arith.constant 0 : index
    %29 = vector.load %arg7[%c0_16, %c0_17] : memref<16x8xf32, #tpu.memory_space<vmem>>, vector<16x8xf32>
    tpu.vector_store %arg7[%c0_16, %c0_17], %28 {strides = array<i32>} : memref<16x8xf32, #tpu.memory_space<vmem>>, vector<16x8xf32>,
    return
  }
  func.func @transform_0(%arg0: i32) -> (i32, i32) {
    %c0_i32 = arith.constant 0 : i32
    %c0_i32_0 = arith.constant 0 : i32
    return %arg0, %c0_i32 : i32, i32
  }
  func.func @transform_1(%arg0: i32) -> (i32, i32, i32) {
    %c0_i32 = arith.constant 0 : i32
    %c0_i32_0 = arith.constant 0 : i32
    %c0_i32_1 = arith.constant 0 : i32
    return %arg0, %c0_i32, %c0_i32_0 : i32, i32, i32
  }
  func.func @transform_2(%arg0: i32) -> (i32, i32) {
    %c0_i32 = arith.constant 0 : i32
    %c0_i32_0 = arith.constant 0 : i32
    %c0_i32_1 = arith.constant 0 : i32
    return %c0_i32, %c0_i32_0 : i32, i32
  }
  func.func @transform_3(%arg0: i32) -> (i32, i32) {
    %c0_i32 = arith.constant 0 : i32
    %c0_i32_0 = arith.constant 0 : i32
    %c0_i32_1 = arith.constant 0 : i32
    return %c0_i32, %c0_i32_0 : i32, i32
  }
  func.func @transform_4(%arg0: i32) -> (i32, i32) {
    %c0_i32 = arith.constant 0 : i32
    %c0_i32_0 = arith.constant 0 : i32
    %c0_i32_1 = arith.constant 0 : i32
    return %c0_i32, %c0_i32_0 : i32, i32
  }
  func.func @transform_5(%arg0: i32) -> (i32, i32) {
    %c0_i32 = arith.constant 0 : i32
    %c0_i32_0 = arith.constant 0 : i32
    %c0_i32_1 = arith.constant 0 : i32
    return %c0_i32, %c0_i32_0 : i32, i32
  }
  func.func @transform_6(%arg0: i32) -> (i32, i32) {
    %c0_i32 = arith.constant 0 : i32
    %c0_i32_0 = arith.constant 0 : i32
    return %arg0, %c0_i32 : i32, i32
  }
}

</mosaic_0001>

<bundles_post_ra>
// kernel: attention_forward.1
= control target key start
LH: loop header
LB: loop body
LE: loop exit
PB: predicated region body
PF: predicated region fallthrough
CT: control target
= control target key end

     0   :  { %vm67_vm0 = vcmask 261120   ;;  %vm396_vm1 = vcmask 1041409   ;;  %vm398_vm2 = vcmask 1042434   ;;  %vm400_vm3 = vcmask 1043459   ;;  %s1821_s2 = inlined_call_operand.vmem [shape: bf16[32,32], index: 2, kind: input, shape index: {}]   ;;  %s1822_s3 = inlined_call_operand.vmem [shape: bf16[32,32], index: 3, kind: input, shape index: {}]   ;;  %s1823_s0 = inlined_call_operand.vmem [shape: bf16[16,32], index: 0, kind: input, shape index: {}]   ;;  %s1824_s1 = inlined_call_operand.vmem [shape: bf16[16,8,32], index: 1, kind: input, shape index: {}]   ;;  %s1825_s4 = inlined_call_operand.vmem [shape: f32[1,32], index: 4, kind: input, shape index: {}]   ;;  %s1826_s5 = inlined_call_operand.vmem [shape: f32[1,32], index: 5, kind: input, shape index: {}]   ;;  %s1827_s6 = inlined_call_operand.vmem [shape: f32[16,8], index: 6, kind: output, shape index: {}]  }
   0x1   :  { %v1057_v0 = vld [vmem:[%s1821_s2 + $0x8] sm:$0xff]  ;;  %v1056_v2 = vld [vmem:[%s1821_s2] sm:$0xff]  ;;  %v1051_v6 = vld [vmem:[%s1824_s1 + $0x18] sm:$0xff]  ;;  %vm402_vm4 = vcmask 1044484   ;;  %vm1831_vm5 = vcmask 1045509   ;;  %vm1830_vm6 = vcmask 1046534  }
   0x2   :  { %v1059_v1 = vld [vmem:[%s1822_s3 + $0x8] sm:$0xff]  ;;  %77 = vmatpush.bf16.msra.mxu0 %v1057_v0  ;;  %v1058_v3 = vld [vmem:[%s1822_s3] sm:$0xff]  ;;  %v1054_v7 = vld [vmem:[%s1824_s1 + $0x30] sm:$0xff]  ;;  %vm1829_vm7 = vcmask 1047559   ;;  %vm1828_vm8 = vcmask 64512  }
   0x3   :  { %171 = vmatpush.bf16.msra.mxu1 %v1059_v1  ;;  %1060 = vmatpush.bf16.msra.mxu2 %v1059_v1  ;;  %v1047_v4 = vld [vmem:[%s1823_s0] sm:$0xff]  ;;  %v1049_v8 = vld [vmem:[%s1824_s1 + $0x8] sm:$0xff]  ;;  %v1055_v10 = vld [vmem:[%s1824_s1 + $0x38] sm:$0xff] }
   0x4   :  { %1061 = vmatpush.bf16.msra.mxu3 %v1059_v1  ;;  %v1048_v5 = vld [vmem:[%s1824_s1] sm:$0xff]  ;;  %v1050_v11 = vld [vmem:[%s1824_s1 + $0x10] sm:$0xff]  ;;  %v1053_v12 = vld [vmem:[%s1824_s1 + $0x28] sm:$0xff] }
   0x5   :  { %v1052_v9 = vld [vmem:[%s1824_s1 + $0x20] sm:$0xff] }
   0x6   :  { %78 = vmatpush.bf16.msra.mxu0 %v1056_v2  ;;  %v1068_v13 = vld [vmem:[%s1825_s4] ss:$0 sm:$0xff] }
   0x7   :  { %172 = vmatpush.bf16.msra.mxu1 %v1058_v3  ;;  %1062 = vmatpush.bf16.msra.mxu2 %v1058_v3  ;;  %v1263_v29 = vld [vmem:[%s1826_s5] ss:$0 sm:$0xff] }
   0x8   :  { %1063 = vmatpush.bf16.msra.mxu3 %v1058_v3 }
   0x9   :  { %998 = vmatmul.msk.bf16.vlgmr.msra.gmra.mxu0 %vm67_vm0, %v1047_v4 }
   0xa   :  { %1039 = vmatmul.msk.bf16.vlgmr.msra.gmra.mxu1 %vm67_vm0, %v1048_v5  ;;  %1042 = vmatmul.msk.bf16.vlgmr.msra.gmra.mxu2 %vm67_vm0, %v1051_v6 }
   0xb   :  { %1045 = vmatmul.msk.bf16.vlgmr.msra.gmra.mxu3 %vm67_vm0, %v1054_v7 }
  0x1a   :  { %1040 = vmatmul.msk.bf16.gmra.mxu1 %vm67_vm0, %v1049_v8  ;;  %1043 = vmatmul.msk.bf16.gmra.mxu2 %vm67_vm0, %v1052_v9 }
  0x1b   :  { %1046 = vmatmul.msk.bf16.gmra.mxu3 %vm67_vm0, %v1055_v10 }
  0x2a   :  { %1041 = vmatmul.msk.bf16.gmra.mxu1 %vm67_vm0, %v1050_v11  ;;  %1044 = vmatmul.msk.bf16.gmra.mxu2 %vm67_vm0, %v1053_v12 }
  0x86   :  { %v80_v14 = vpop.f32.mrf.mxu0 }
  0x87   :  { %v174_v15 = vpop.f32.mrf.mxu1  ;;  %v1253_v16 = vadd.f32 %v1068_v13, %v80_v14 }
  0x89   :  { %v230_v17 = vperm.slane %v1253_v16, 0  ;;  %v221_v18 = vrot.slane %v1253_v16, 6  ;;  %v216_v21 = vrot.slane %v1253_v16, 1  ;;  %v217_v34 = vrot.slane %v1253_v16, 2 }
  0x8a   :  { %v218_v50 = vrot.slane %v1253_v16, 3  ;;  %v219_v59 = vrot.slane %v1253_v16, 4 }
  0x8b   :  { %v262_v19 = vadd.f32 %v230_v17, %v174_v15  ;;  %v236_v20 = vperm.slane %v221_v18, 0  ;;  %v231_v28 = vperm.slane %v216_v21, 0  ;;  %v232_v44 = vperm.slane %v217_v34, 0 }
  0x8c   :  { %v233_v58 = vperm.slane %v218_v50, 0  ;;  %v234_v4 = vperm.slane %v219_v59, 0  ;;  %v220_v18 = vrot.slane %v1253_v16, 5 }
  0x8d   :  { %1070 = vtanh.f32 %v262_v19  ;;  %v189_v22 = vpop.f32.mrf.mxu2 }
  0x8e   :  { %v204_v23 = vpop.f32.mrf.mxu3  ;;  %v268_v24 = vadd.f32 %v236_v20, %v189_v22  ;;  %v82_v25 = vpop.f32.mrf.mxu0 }
  0x8f   :  { %v176_v26 = vpop.f32.mrf.mxu1  ;;  %v1258_v27 = vadd.f32 %v1068_v13, %v82_v25 }
  0x90   :  { %1072 = vtanh.f32 %v268_v24  ;;  %v263_v35 = vadd.f32 %v231_v28, %v176_v26  ;;  %v235_v26 = vperm.slane %v220_v18, 0 }
  0x91   :  { %v227_v30 = vrot.slane %v1258_v27, 5  ;;  %v226_v31 = vrot.slane %v1258_v27, 4  ;;  %v238_v48 = vperm.slane %v1258_v27, 0  ;;  %v223_v3 = vrot.slane %v1258_v27, 1 }
  0x92   :  { %1074 = vtanh.f32 %v263_v35  ;;  %v224_v10 = vrot.slane %v1258_v27, 2  ;;  %v228_v20 = vrot.slane %v1258_v27, 6  ;;  %v229_v34 = vrot.slane %v1258_v27, 7 }
  0x93   :  { %v1071_v32 = vpop.eup %1070  ;;  %v243_v33 = vperm.slane %v227_v30, 0  ;;  %v242_v37 = vperm.slane %v226_v31, 0  ;;  %v239_v11 = vperm.slane %v223_v3, 0  ;;  %v225_v30 = vrot.slane %v1258_v27, 3 }
  0x94   :  { %v298_v36 = vmul.f32 %v1071_v32, %v1263_v29  ;;  %v240_v17 = vperm.slane %v224_v10, 0  ;;  %v244_v31 = vperm.slane %v228_v20, 0 }
  0x95   :  { %v1269_v38 = vpop.f32.mrf.mxu2  ;;  %v274_v45 = vadd.f32 %v242_v37, %v204_v23 }
  0x96   :  { %v206_v39 = vpop.f32.mrf.mxu3  ;;  %v314_v42 = vsel %vm67_vm0, %v298_v36, 0.0  ;;  %v1073_v43 = vpop.eup %1072 }
  0x97   :  { %v275_v40 = vadd.f32 %v243_v33, %v206_v39  ;;  %v179_v41 = vpop.f32.mrf.mxu1  ;;  %315 = vadd.xlane.f32.xlu0 %v314_v42  ;;  %v304_v46 = vmul.f32 %v1073_v43, %v1263_v29  ;;  %v222_v33 = vrot.slane %v1253_v16, 7 }
  0x98   :  { %v264_v47 = vadd.f32 %v232_v44, %v179_v41  ;;  %v1075_v51 = vpop.eup %1074 }
  0x99   :  { %1076 = vtanh.f32 %v275_v40  ;;  %v332_v54 = vsel %vm67_vm0, %v304_v46, 0.0  ;;  %v299_v62 = vmul.f32 %v1075_v51, %v1263_v29  ;;  %v241_v40 = vperm.slane %v225_v30, 0 }
  0x9a   :  { %1078 = vtanh.f32 %v274_v45  ;;  %v237_v45 = vperm.slane %v222_v33, 0  ;;  %v245_v46 = vperm.slane %v229_v34, 0 }
  0x9b   :  { %1080 = vtanh.f32 %v264_v47  ;;  %v317_v6 = vsel %vm67_vm0, %v299_v62, 0.0 }
  0x9d   :  { %v194_v49 = vpop.f32.mrf.mxu2 }
  0x9e   :  { %v270_v52 = vadd.f32 %v238_v48, %v194_v49  ;;  %v209_v13 = vpop.f32.mrf.mxu3  ;;  %v269_v49 = vadd.f32 %v237_v45, %v1269_v38 }
  0x9f   :  { %v181_v53 = vpop.f32.mrf.mxu1  ;;  %v1077_v55 = vpop.eup %1076  ;;  %333 = vadd.xlane.f32.xlu0 %v332_v54  ;;  %v276_v36 = vadd.f32 %v244_v31, %v209_v13 }
  0xa0   :  { %v311_v56 = vmul.f32 %v1077_v55, %v1263_v29  ;;  %v1079_v57 = vpop.eup %1078  ;;  %1082 = vtanh.f32 %v270_v52  ;;  %v265_v63 = vadd.f32 %v233_v58, %v181_v53 }
  0xa1   :  { %v310_v60 = vmul.f32 %v1079_v57, %v1263_v29  ;;  %v1081_v1 = vpop.eup %1080 }
  0xa2   :  { %v353_v61 = vsel %vm67_vm0, %v311_v56, 0.0  ;;  %1084 = vtanh.f32 %v265_v63  ;;  %v300_v9 = vmul.f32 %v1081_v1, %v1263_v29 }
  0xa3   :  { %354 = vadd.xlane.f32.xlu2 %v353_v61  ;;  %v350_v0 = vsel %vm67_vm0, %v310_v60, 0.0 }
  0xa4   :  { %351 = vadd.xlane.f32.xlu1 %v350_v0  ;;  %v320_v15 = vsel %vm67_vm0, %v300_v9, 0.0  ;;  %v378_v9 = vlaneseq }
  0xa5   :  { %v196_v2 = vpop.f32.mrf.mxu2 }
  0xa6   :  { %v1083_v7 = vpop.eup %1082  ;;  %v271_v14 = vadd.f32 %v239_v11, %v196_v2  ;;  %v211_v42 = vpop.f32.mrf.mxu3  ;;  %v1331_v11 = vand.u32 127, %v378_v9 }
  0xa7   :  { %v184_v5 = vpop.f32.mrf.mxu1  ;;  %318 = vadd.xlane.f32.xlu0 %v317_v6  ;;  %v306_v12 = vmul.f32 %v1083_v7, %v1263_v29  ;;  %v277_v27 = vadd.f32 %v245_v46, %v211_v42 }
  0xa8   :  { %v266_v8 = vadd.f32 %v234_v4, %v184_v5  ;;  %v1085_v19 = vpop.eup %1084 }
  0xa9   :  { %v338_v23 = vsel %vm67_vm0, %v306_v12, 0.0  ;;  %v301_v28 = vmul.f32 %v1085_v19, %v1263_v29 }
  0xaa   :  { %1086 = vtanh.f32 %v266_v8 }
  0xab   :  { %1088 = vtanh.f32 %v271_v14  ;;  %v323_v39 = vsel %vm67_vm0, %v301_v28, 0.0 }
  0xac   :  { %321 = vadd.xlane.f32.xlu1 %v320_v15 }
  0xad   :  { %v199_v21 = vpop.f32.mrf.mxu2 }
  0xae   :  { %v272_v22 = vadd.f32 %v240_v17, %v199_v21 }
  0xaf   :  { %v186_v24 = vpop.f32.mrf.mxu1  ;;  %339 = vadd.xlane.f32.xlu0 %v338_v23 }
  0xb0   :  { %v1087_v25 = vpop.eup %1086  ;;  %1090 = vtanh.f32 %v272_v22  ;;  %v267_v35 = vadd.f32 %v235_v26, %v186_v24 }
  0xb1   :  { %v302_v32 = vmul.f32 %v1087_v25, %v1263_v29  ;;  %v1089_v41 = vpop.eup %1088 }
  0xb2   :  { %1092 = vtanh.f32 %v267_v35  ;;  %v307_v48 = vmul.f32 %v1089_v41, %v1263_v29 }
  0xb3   :  { %v326_v37 = vsel %vm67_vm0, %v302_v32, 0.0  ;;  %1094 = vtanh.f32 %v276_v36 }
  0xb4   :  { %327 = vadd.xlane.f32.xlu2 %v326_v37  ;;  %324 = vadd.xlane.f32.xlu1 %v323_v39  ;;  %v341_v52 = vsel %vm67_vm0, %v307_v48, 0.0 }
  0xb5   :  { %v201_v43 = vpop.f32.mrf.mxu2 }
  0xb6   :  { %v1091_v44 = vpop.eup %1090  ;;  %v273_v47 = vadd.f32 %v241_v40, %v201_v43 }
  0xb7   :  { %v308_v16 = vmul.f32 %v1091_v44, %v1263_v29 }
  0xb8   :  { %1096 = vtanh.f32 %v273_v47  ;;  %v1093_v51 = vpop.eup %1092 }
  0xb9   :  { %v344_v50 = vsel %vm67_vm0, %v308_v16, 0.0  ;;  %1098 = vtanh.f32 %v277_v27  ;;  %v1095_v53 = vpop.eup %1094  ;;  %v303_v56 = vmul.f32 %v1093_v51, %v1263_v29 }
  0xba   :  { %1100 = vtanh.f32 %v269_v49  ;;  %v312_v57 = vmul.f32 %v1095_v53, %v1263_v29  ;;  %v1166_v53 = vmov 0  }
  0xbb   :  { %v329_v59 = vsel %vm67_vm0, %v303_v56, 0.0  ;;  %1067 = vset.pattern.permute.xlu2 %v1166_v53  ;;  %1066 = vset.pattern.permute.xlu1 %v1166_v53 }
  0xbc   :  { %345 = vadd.xlane.f32.xlu2 %v344_v50  ;;  %342 = vadd.xlane.f32.xlu1 %v341_v52  ;;  %v356_v61 = vsel %vm67_vm0, %v312_v57, 0.0 }
  0xbd   :  { %1065 = vset.pattern.permute.xlu0 %v1166_v53 }
  0xbe   :  { %v1097_v54 = vpop.eup %1096 }
  0xbf   :  { %v309_v55 = vmul.f32 %v1097_v54, %v1263_v29  ;;  %v1099_v38 = vpop.eup %1098 }
  0xc0   :  { %v1101_v60 = vpop.eup %1100  ;;  %v313_v62 = vmul.f32 %v1099_v38, %v1263_v29 }
  0xc1   :  { %v347_v58 = vsel %vm67_vm0, %v309_v55, 0.0  ;;  %v305_v63 = vmul.f32 %v1101_v60, %v1263_v29 }
  0xc2   :  { %348 = vadd.xlane.f32.xlu0 %v347_v58  ;;  %v359_v0 = vsel %vm67_vm0, %v313_v62, 0.0 }
  0xc3   :  { %v335_v1 = vsel %vm67_vm0, %v305_v63, 0.0 }
  0xc4   :  { %330 = vadd.xlane.f32.xlu2 %v329_v59  ;;  %357 = vadd.xlane.f32.xlu1 %v356_v61 }
  0xca   :  { %360 = vadd.xlane.f32.xlu0 %v359_v0 }
  0xcc   :  { %336 = vadd.xlane.f32.xlu2 %v335_v1 }
 0x10a   :  { %v1313_v2 = vpop.xlane.xlu0 %315 }
 0x10b   :  { %v380_v19 = vperm.slane %v1313_v2, %v1331_v11 }
 0x112   :  { %v1317_v4 = vpop.xlane.xlu0 %333 }
 0x113   :  { %v386_v46 = vperm.slane %v1317_v4, %v1331_v11 }
 0x116   :  { %v1319_v5 = vpop.xlane.xlu2 %354 }
 0x117   :  { %v1315_v3 = vpop.xlane.xlu1 %351  ;;  %v393_v35 = vperm.slane %v1319_v5, %v1331_v11 }
 0x118   :  { %v392_v26 = vperm.slane %v1315_v3, %v1331_v11 }
 0x11a   :  { %v1323_v7 = vpop.xlane.xlu0 %318 }
 0x11b   :  { %v381_v15 = vperm.slane %v1323_v7, %v1331_v11 }
 0x11d   :  { %v397_v23 = vsel %vm396_vm1, %v381_v15, %v380_v19 }
 0x11f   :  { %v1321_v6 = vpop.xlane.xlu1 %321 }
 0x120   :  { %v382_v21 = vperm.slane %v1321_v6, %v1331_v11 }
 0x122   :  { %v1329_v10 = vpop.xlane.xlu0 %339  ;;  %v399_v32 = vsel %vm398_vm2, %v382_v21, %v397_v23 }
 0x123   :  { %v388_v17 = vperm.slane %v1329_v10, %v1331_v11 }
 0x127   :  { %v1325_v8 = vpop.xlane.xlu2 %327  ;;  %v1327_v29 = vpop.xlane.xlu1 %324 }
 0x128   :  { %v383_v24 = vperm.slane %v1327_v29, %v1331_v11  ;;  %v384_v33 = vperm.slane %v1325_v8, %v1331_v11 }
 0x12a   :  { %v401_v36 = vsel %vm400_vm3, %v383_v24, %v399_v32 }
 0x12b   :  { %v403_v41 = vsel %vm402_vm4, %v384_v33, %v401_v36 }
 0x12f   :  { %v1333_v12 = vpop.xlane.xlu2 %345  ;;  %v1335_v13 = vpop.xlane.xlu1 %342 }
 0x130   :  { %v389_v14 = vperm.slane %v1335_v13, %v1331_v11  ;;  %v390_v18 = vperm.slane %v1333_v12, %v1331_v11 }
 0x132   :  { %v410_v20 = vsel %vm396_vm1, %v389_v14, %v388_v17 }
 0x133   :  { %v411_v28 = vsel %vm398_vm2, %v390_v18, %v410_v20 }
 0x135   :  { %v1350_v22 = vpop.xlane.xlu0 %348 }
 0x136   :  { %v391_v25 = vperm.slane %v1350_v22, %v1331_v11 }
 0x137   :  { %v1360_v30 = vpop.xlane.xlu2 %330  ;;  %v1370_v37 = vpop.xlane.xlu1 %357 }
 0x138   :  { %v412_v31 = vsel %vm400_vm3, %v391_v25, %v411_v28  ;;  %v385_v39 = vperm.slane %v1360_v30, %v1331_v11  ;;  %v394_v42 = vperm.slane %v1370_v37, %v1331_v11 }
 0x139   :  { %v413_v34 = vsel %vm402_vm4, %v392_v26, %v412_v31 }
 0x13a   :  { %v414_v40 = vsel %vm1831_vm5, %v393_v35, %v413_v34  ;;  %v405_v45 = vsel %vm1831_vm5, %v385_v39, %v403_v41 }
 0x13b   :  { %v415_v16 = vsel %vm1830_vm6, %v394_v42, %v414_v40  ;;  %v407_v50 = vsel %vm1830_vm6, %v386_v46, %v405_v45 }
 0x13d   :  { %v1378_v43 = vpop.xlane.xlu0 %360 }
 0x13e   :  { %v395_v44 = vperm.slane %v1378_v43, %v1331_v11 }
 0x13f   :  { %v337_v47 = vpop.xlane.xlu2 %336 }
 0x140   :  { %v387_v27 = vperm.slane %v337_v47, %v1331_v11  ;;  %v416_v48 = vsel %vm1829_vm7, %v395_v44, %v415_v16 }
 0x141   :  { %v423_v49 = vsel %vm1828_vm8, %v416_v48, -inf }
 0x142   :  { %424 = vmax.xlane.f32.xlu2 %v423_v49  ;;  %v409_v51 = vsel %vm1829_vm7, %v387_v27, %v407_v50 }
 0x143   :  { %v420_v52 = vsel %vm1828_vm8, %v409_v51, -inf }
 0x144   :  { %421 = vmax.xlane.f32.xlu1 %v420_v52 }
 0x1b5   :  { %v1396_v15 = vpop.xlane.xlu2 %424 }
 0x1b6   :  { %v437_v28 = vperm.slane %v1396_v15, 1  ;;  %v441_v32 = vperm.slane %v1396_v15, 5  ;;  %v436_v35 = vperm.slane %v1396_v15, 0  ;;  %v440_v41 = vperm.slane %v1396_v15, 4 }
 0x1b7   :  { %v422_v54 = vpop.xlane.xlu1 %421  ;;  %v439_v46 = vperm.slane %v1396_v15, 3  ;;  %v443_v27 = vperm.slane %v1396_v15, 7  ;;  %v442_v50 = vperm.slane %v1396_v15, 6 }
 0x1b8   :  { %v429_v55 = vperm.slane %v422_v54, 1  ;;  %v428_v56 = vperm.slane %v422_v54, 0  ;;  %v430_v57 = vperm.slane %v422_v54, 2  ;;  %v432_v60 = vperm.slane %v422_v54, 4 }
 0x1b9   :  { %v435_v61 = vperm.slane %v422_v54, 7  ;;  %v431_v62 = vperm.slane %v422_v54, 3  ;;  %v433_v21 = vperm.slane %v422_v54, 5  ;;  %v468_v39 = vsub.f32 %v1329_v10, %v436_v35 }
 0x1ba   :  { %v461_v58 = vsub.f32 %v1323_v7, %v429_v55  ;;  %v460_v38 = vsub.f32 %v1313_v2, %v428_v56  ;;  %v462_v59 = vsub.f32 %v1321_v6, %v430_v57  ;;  %v464_v9 = vsub.f32 %v1325_v8, %v432_v60 }
 0x1bb   :  { %v467_v14 = vsub.f32 %v337_v47, %v435_v61  ;;  %v463_v7 = vsub.f32 %v1327_v29, %v431_v62  ;;  %v434_v2 = vperm.slane %v422_v54, 6  ;;  %v438_v6 = vperm.slane %v1396_v15, 2 }
 0x1bc   :  { %v478_v63 = vmul.f32 1.442695, %v461_v58  ;;  %v476_v0 = vmul.f32 1.442695, %v460_v38  ;;  %v480_v1 = vmul.f32 1.442695, %v462_v59  ;;  %v465_v25 = vsub.f32 %v1360_v30, %v433_v21 }
 0x1bd   :  { %v484_v17 = vmul.f32 1.442695, %v464_v9  ;;  %v490_v18 = vmul.f32 1.442695, %v467_v14  ;;  %v482_v20 = vmul.f32 1.442695, %v463_v7  ;;  %v466_v29 = vsub.f32 %v1317_v4, %v434_v2 }
 0x1be   :  { %1102 = vpow2.f32 %v478_v63  ;;  %v470_v24 = vsub.f32 %v1333_v12, %v438_v6  ;;  %v486_v34 = vmul.f32 1.442695, %v465_v25  ;;  %v469_v12 = vsub.f32 %v1335_v13, %v437_v28 }
 0x1bf   :  { %1104 = vpow2.f32 %v476_v0  ;;  %v488_v26 = vmul.f32 1.442695, %v466_v29  ;;  %v473_v30 = vsub.f32 %v1319_v5, %v441_v32  ;;  %v492_v45 = vmul.f32 1.442695, %v468_v39 }
 0x1c0   :  { %1106 = vpow2.f32 %v480_v1  ;;  %v496_v31 = vmul.f32 1.442695, %v470_v24  ;;  %v494_v40 = vmul.f32 1.442695, %v469_v12  ;;  %v472_v5 = vsub.f32 %v1315_v3, %v440_v41 }
 0x1c1   :  { %1108 = vpow2.f32 %v484_v17  ;;  %v502_v42 = vmul.f32 1.442695, %v473_v30  ;;  %v471_v10 = vsub.f32 %v1350_v22, %v439_v46  ;;  %v475_v3 = vsub.f32 %v1378_v43, %v443_v27 }
 0x1c2   :  { %1110 = vpow2.f32 %v490_v18  ;;  %v500_v16 = vmul.f32 1.442695, %v472_v5  ;;  %v474_v22 = vsub.f32 %v1370_v37, %v442_v50 }
 0x1c3   :  { %1112 = vpow2.f32 %v482_v20  ;;  %v498_v49 = vmul.f32 1.442695, %v471_v10  ;;  %v506_v53 = vmul.f32 1.442695, %v475_v3 }
 0x1c4   :  { %v1400_v19 = vpop.eup %1102  ;;  %1114 = vpow2.f32 %v488_v26  ;;  %v504_v55 = vmul.f32 1.442695, %v474_v22 }
 0x1c5   :  { %v1402_v23 = vpop.eup %1104  ;;  %528 = vperm.xlu1 %1066, %v1400_v19   ;;  %1116 = vpow2.f32 %v496_v31 }
 0x1c6   :  { %v1405_v8 = vpop.eup %1106  ;;  %525 = vperm.xlu0 %1065, %v1402_v23   ;;  %1118 = vpow2.f32 %v486_v34 }
 0x1c7   :  { %531 = vperm.xlu2 %1067, %v1405_v8   ;;  %v1414_v33 = vpop.eup %1108  ;;  %1120 = vpow2.f32 %v494_v40 }
 0x1c8   :  { %v1417_v4 = vpop.eup %1110  ;;  %1122 = vpow2.f32 %v502_v42 }
 0x1c9   :  { %v1420_v36 = vpop.eup %1112  ;;  %1124 = vpow2.f32 %v492_v45 }
 0x1ca   :  { %v1428_v44 = vpop.eup %1114  ;;  %1126 = vpow2.f32 %v500_v16 }
 0x1cb   :  { %v1431_v47 = vpop.eup %1116  ;;  %1128 = vpow2.f32 %v498_v49 }
 0x1cc   :  { %v1434_v13 = vpop.eup %1118  ;;  %1130 = vpow2.f32 %v506_v53 }
 0x1cd   :  { %537 = vperm.xlu1 %1066, %v1414_v33   ;;  %v1441_v48 = vpop.eup %1120  ;;  %1132 = vpow2.f32 %v504_v55 }
 0x1ce   :  { %546 = vperm.xlu0 %1065, %v1417_v4   ;;  %v1444_v51 = vpop.eup %1122 }
 0x1cf   :  { %534 = vperm.xlu2 %1067, %v1420_v36   ;;  %v1447_v52 = vpop.eup %1124 }
 0x1d0   :  { %v1453_v54 = vpop.eup %1126 }
 0x1d1   :  { %v1456_v56 = vpop.eup %1128 }
 0x1d2   :  { %v1459_v57 = vpop.eup %1130 }
 0x1d3   :  { %v1462_v43 = vpop.eup %1132 }
 0x1d5   :  { %543 = vperm.xlu1 %1066, %v1428_v44  }
 0x1d6   :  { %555 = vperm.xlu0 %1065, %v1431_v47  }
 0x1d7   :  { %540 = vperm.xlu2 %1067, %v1434_v13  }
 0x1dd   :  { %552 = vperm.xlu1 %1066, %v1441_v48  }
 0x1de   :  { %564 = vperm.xlu0 %1065, %v1444_v51  }
 0x1df   :  { %549 = vperm.xlu2 %1067, %v1447_v52  }
 0x1e5   :  { %561 = vperm.xlu1 %1066, %v1453_v54  }
 0x1e7   :  { %558 = vperm.xlu2 %1067, %v1456_v56  }
 0x1ed   :  { %570 = vperm.xlu1 %1066, %v1459_v57  }
 0x1ef   :  { %567 = vperm.xlu2 %1067, %v1462_v43  }
 0x221   :  { %v532_v37 = vpop.permute.xlu2 %531 }
 0x222   :  { %v574_v1 = vperm.slane %v532_v37, %v1331_v11 }
 0x229   :  { %v535_v58 = vpop.permute.xlu2 %534 }
 0x22a   :  { %v575_v15 = vperm.slane %v535_v58, %v1331_v11 }
 0x231   :  { %v541_v62 = vpop.permute.xlu2 %540 }
 0x232   :  { %v577_v18 = vperm.slane %v541_v62, %v1331_v11 }
 0x237   :  { %v529_v38 = vpop.permute.xlu1 %528 }
 0x238   :  { %v526_v59 = vpop.permute.xlu0 %525  ;;  %v573_v60 = vperm.slane %v529_v38, %v1331_v11 }
 0x239   :  { %v572_v61 = vperm.slane %v526_v59, %v1331_v11  ;;  %v550_v20 = vpop.permute.xlu2 %549 }
 0x23a   :  { %v580_v35 = vperm.slane %v550_v20, %v1331_v11 }
 0x23b   :  { %v588_v63 = vsel %vm396_vm1, %v573_v60, %v572_v61 }
 0x23c   :  { %v589_v9 = vsel %vm398_vm2, %v574_v1, %v588_v63 }
 0x23d   :  { %v590_v7 = vsel %vm400_vm3, %v575_v15, %v589_v9 }
 0x23f   :  { %v538_v0 = vpop.permute.xlu1 %537 }
 0x240   :  { %v576_v14 = vperm.slane %v538_v0, %v1331_v11  ;;  %v547_v17 = vpop.permute.xlu0 %546 }
 0x241   :  { %v579_v29 = vperm.slane %v547_v17, %v1331_v11  ;;  %v559_v12 = vpop.permute.xlu2 %558 }
 0x242   :  { %v591_v2 = vsel %vm402_vm4, %v576_v14, %v590_v7  ;;  %v583_v42 = vperm.slane %v559_v12, %v1331_v11 }
 0x243   :  { %v592_v24 = vsel %vm1831_vm5, %v577_v18, %v591_v2 }
 0x247   :  { %v544_v6 = vpop.permute.xlu1 %543 }
 0x248   :  { %v578_v21 = vperm.slane %v544_v6, %v1331_v11  ;;  %v556_v31 = vpop.permute.xlu0 %555 }
 0x249   :  { %v582_v39 = vperm.slane %v556_v31, %v1331_v11  ;;  %v568_v16 = vpop.permute.xlu2 %567 }
 0x24a   :  { %v593_v25 = vsel %vm1830_vm6, %v578_v21, %v592_v24  ;;  %v586_v50 = vperm.slane %v568_v16, %v1331_v11 }
 0x24b   :  { %v594_v26 = vsel %vm1829_vm7, %v579_v29, %v593_v25 }
 0x24c   :  { %v604_v28 = vsel %vm1828_vm8, %v594_v26, 0.0 }
 0x24d   :  { %605 = vadd.xlane.f32.xlu0 %v604_v28 }
 0x24f   :  { %v553_v32 = vpop.permute.xlu1 %552 }
 0x250   :  { %v581_v34 = vperm.slane %v553_v32, %v1331_v11  ;;  %v565_v46 = vpop.permute.xlu0 %564 }
 0x251   :  { %v585_v27 = vperm.slane %v565_v46, %v1331_v11 }
 0x252   :  { %v595_v30 = vsel %vm396_vm1, %v581_v34, %v580_v35 }
 0x253   :  { %v596_v40 = vsel %vm398_vm2, %v582_v39, %v595_v30 }
 0x254   :  { %v597_v5 = vsel %vm400_vm3, %v583_v42, %v596_v40 }
 0x257   :  { %v562_v41 = vpop.permute.xlu1 %561 }
 0x258   :  { %v584_v45 = vperm.slane %v562_v41, %v1331_v11 }
 0x25a   :  { %v598_v10 = vsel %vm402_vm4, %v584_v45, %v597_v5 }
 0x25b   :  { %v599_v49 = vsel %vm1831_vm5, %v585_v27, %v598_v10 }
 0x25c   :  { %v600_v53 = vsel %vm1830_vm6, %v586_v50, %v599_v49 }
 0x25f   :  { %v571_v3 = vpop.permute.xlu1 %570 }
 0x260   :  { %v587_v22 = vperm.slane %v571_v3, %v1331_v11 }
 0x262   :  { %v601_v55 = vsel %vm1829_vm7, %v587_v22, %v600_v53 }
 0x263   :  { %v607_v37 = vsel %vm1828_vm8, %v601_v55, 0.0 }
 0x264   :  { %608 = vadd.xlane.f32.xlu2 %v607_v37 }
 0x2c0   :  { %v606_v58 = vpop.xlane.xlu0 %605 }
 0x2c1   :  { %v612_v38 = vperm.slane %v606_v58, 0  ;;  %v1497_v59 = vperm.slane %v606_v58, 1  ;;  %v1499_v60 = vperm.slane %v606_v58, 2  ;;  %v1501_v61 = vperm.slane %v606_v58, 3 }
 0x2c2   :  { %v1504_v62 = vperm.slane %v606_v58, 6  ;;  %v1507_v63 = vperm.slane %v606_v58, 7  ;;  %v1519_v2 = vperm.slane %v606_v58, 4  ;;  %v1521_v18 = vperm.slane %v606_v58, 5 }
 0x2c3   :  { %1134 = vrcp.f32 %v612_v38  ;;  %v653_v7 = vand.u32 2147483647, %v612_v38  ;;  %vm649_vm9 = vweird.f32 %v612_v38  ;;  %v655_v24 = vand.u32 2147483648, %v612_v38 }
 0x2c4   :  { %1136 = vrcp.f32 %v1497_v59  ;;  %v760_v15 = vand.u32 2147483648, %v1507_v63  ;;  %v758_v29 = vand.u32 2147483647, %v1507_v63  ;;  %vm739_vm10 = vweird.f32 %v1504_v62 }
 0x2c5   :  { %1138 = vrcp.f32 %v1499_v60  ;;  %v743_v26 = vand.u32 2147483647, %v1504_v62  ;;  %v745_v28 = vand.u32 2147483648, %v1504_v62  ;;  %vm754_vm12 = vweird.f32 %v1507_v63 }
 0x2c6   :  { %1140 = vrcp.f32 %v1501_v61  ;;  %v761_v34 = vor.u32 1.1754944e-38, %v760_v15  ;;  %vm1532_vm13 = vcmp.eq.f32.partialorder %v653_v7, 8.507059e+37  ;;  %vm1542_vm14 = vcmp.eq.f32.partialorder %v758_v29, 8.507059e+37 }
 0x2c7   :  { %1142 = vrcp.f32 %v1504_v62  ;;  %v656_v5 = vor.u32 1.1754944e-38, %v655_v24  ;;  %vm664_vm0 = vweird.f32 %v1497_v59  ;;  %v668_v10 = vand.u32 2147483647, %v1497_v59 }
 0x2c8   :  { %1144 = vrcp.f32 %v1507_v63  ;;  %v670_v22 = vand.u32 2147483648, %v1497_v59 }
 0x2c9   :  { %v1135_v0 = vpop.eup %1134  ;;  %1146 = vrcp.f32 %v1519_v2  ;;  %vm669_vm6 = vcmp.eq.f32.partialorder %v668_v10, 8.507059e+37 }
 0x2ca   :  { %v1511_v1 = vpop.eup %1136  ;;  %v645_v9 = vmul.f32 %v1135_v0, %v612_v38  ;;  %vm650_vm11 = vweird.f32 %v1135_v0  ;;  %v671_v29 = vor.u32 1.1754944e-38, %v670_v22  ;;  %1148 = vrcp.f32 %v1521_v18 }
 0x2cb   :  { %v1514_v14 = vpop.eup %1138  ;;  %v660_v17 = vmul.f32 %v1511_v1, %v1497_v59  ;;  %vm651_vm15 = vmor %vm649_vm9, %vm650_vm11  ;;  %vm665_vm8 = vweird.f32 %v1511_v1 }
 0x2cc   :  { %v646_v6 = vsub.f32 1.0, %v645_v9  ;;  %v675_v20 = vmul.f32 %v1514_v14, %v1499_v60  ;;  %v1525_v21 = vpop.eup %1140  ;;  %v746_v9 = vor.u32 1.1754944e-38, %v745_v28  ;;  %vm1562_vm7 = vmor %vm664_vm0, %vm665_vm8  ;;  %vm680_vm0 = vweird.f32 %v1514_v14 }
 0x2cd   :  { %v661_v25 = vsub.f32 1.0, %v660_v17  ;;  %v1143_v32 = vpop.eup %1142  ;;  %v690_v42 = vmul.f32 %v1525_v21, %v1501_v61 }
 0x2ce   :  { %v647_v31 = vmul.f32 %v1135_v0, %v646_v6  ;;  %v676_v30 = vsub.f32 1.0, %v675_v20  ;;  %v1145_v39 = vpop.eup %1144  ;;  %v735_v40 = vmul.f32 %v1143_v32, %v1504_v62  ;;  %vm740_vm9 = vweird.f32 %v1143_v32 }
 0x2cf   :  { %v662_v12 = vmul.f32 %v1511_v1, %v661_v25  ;;  %v750_v45 = vmul.f32 %v1145_v39, %v1507_v63  ;;  %v691_v58 = vsub.f32 1.0, %v690_v42  ;;  %vm755_vm11 = vweird.f32 %v1145_v39  ;;  %v1566_v7 = vpop.eup %1146  ;;  %vm741_vm8 = vmor %vm739_vm10, %vm740_vm9 }
 0x2d0   :  { %v648_v41 = vadd.f32 %v1135_v0, %v647_v31  ;;  %v736_v16 = vsub.f32 1.0, %v735_v40  ;;  %v677_v53 = vmul.f32 %v1514_v14, %v676_v30  ;;  %v685_v6 = vand.u32 2147483648, %v1499_v60  ;;  %v1623_v46 = vpop.eup %1148 }
 0x2d1   :  { %v663_v49 = vadd.f32 %v1511_v1, %v662_v12  ;;  %v751_v50 = vsub.f32 1.0, %v750_v45  ;;  %v683_v25 = vand.u32 2147483647, %v1499_v60  ;;  %v705_v42 = vmul.f32 %v1566_v7, %v1519_v2 }
 0x2d2   :  { %v652_v27 = vsel %vm651_vm15, %v1135_v0, %v648_v41  ;;  %v737_v55 = vmul.f32 %v1143_v32, %v736_v16  ;;  %vm1556_vm15 = vcmp.eq.f32.partialorder %v743_v26, 8.507059e+37  ;;  %v678_v24 = vadd.f32 %v1514_v14, %v677_v53 }
 0x2d3   :  { %v657_v3 = vsel %vm1532_vm13, %v656_v5, %v652_v27  ;;  %v752_v38 = vmul.f32 %v1145_v39, %v751_v50  ;;  %vm679_vm13 = vweird.f32 %v1499_v60  ;;  %v692_v26 = vmul.f32 %v1525_v21, %v691_v58 }
 0x2d4   :  { %v658_v37 = vmul.f32 %v1402_v23, %v657_v3  ;;  %v738_v17 = vadd.f32 %v1143_v32, %v737_v55  ;;  %v667_v23 = vsel %vm1562_vm7, %v1511_v1, %v663_v49  ;;  %vm756_vm7 = vmor %vm754_vm12, %vm755_vm11  ;;  %v686_v41 = vor.u32 1.1754944e-38, %v685_v6 }
 0x2d5   :  { %v753_v20 = vadd.f32 %v1145_v39, %v752_v38  ;;  %v672_v35 = vsel %vm669_vm6, %v671_v29, %v667_v23  ;;  %vm1596_vm10 = vmor %vm679_vm13, %vm680_vm0  ;;  %v698_v60 = vand.u32 2147483647, %v1501_v61  ;;  %vm684_vm6 = vcmp.eq.f32.partialorder %v683_v25, 8.507059e+37 }
 0x2d6   :  { %901 = vperm.xlu1 %1066, %v658_v37   ;;  %v742_v1 = vsel %vm741_vm8, %v1143_v32, %v738_v17  ;;  %v682_v40 = vsel %vm1596_vm10, %v1514_v14, %v678_v24  ;;  %vm695_vm12 = vweird.f32 %v1525_v21  ;;  %v706_v27 = vsub.f32 1.0, %v705_v42 }
 0x2d7   :  { %v1576_v59 = vpop.xlane.xlu2 %608  ;;  %v757_v28 = vsel %vm756_vm7, %v1145_v39, %v753_v20  ;;  %v747_v62 = vsel %vm1556_vm15, %v746_v9, %v742_v1  ;;  %v687_v45 = vsel %vm684_vm6, %v686_v41, %v682_v40  ;;  %vm1633_vm11 = vcmp.eq.f32.partialorder %v698_v60, 8.507059e+37 }
 0x2d8   :  { %v1588_v31 = vperm.slane %v1576_v59, 2  ;;  %v762_v63 = vsel %vm1542_vm14, %v761_v34, %v757_v28  ;;  %v748_v32 = vmul.f32 %v1428_v44, %v747_v62  ;;  %v1602_v39 = vperm.slane %v1576_v59, 4 }
 0x2d9   :  { %v763_v30 = vmul.f32 %v1417_v4, %v762_v63  ;;  %v1608_v34 = vperm.slane %v1576_v59, 5  ;;  %v673_v44 = vmul.f32 %v1400_v19, %v672_v35  ;;  %v693_v4 = vadd.f32 %v1525_v21, %v692_v26 }
 0x2da   :  { %919 = vperm.xlu2 %1067, %v748_v32   ;;  %1150 = vrcp.f32 %v1588_v31  ;;  %v1618_v14 = vperm.slane %v1576_v59, 7  ;;  %v700_v19 = vand.u32 2147483648, %v1501_v61  ;;  %vm694_vm14 = vweird.f32 %v1501_v61 }
 0x2db   :  { %922 = vperm.xlu0 %1065, %v763_v30   ;;  %1152 = vrcp.f32 %v1602_v39  ;;  %v1626_v5 = vperm.slane %v1576_v59, 0  ;;  %vm1629_vm9 = vmor %vm694_vm14, %vm695_vm12  ;;  %v1638_v49 = vperm.slane %v1576_v59, 1  ;;  %v688_v61 = vmul.f32 %v1405_v8, %v687_v45 }
 0x2dc   :  { %1154 = vrcp.f32 %v1608_v34  ;;  %v803_v50 = vand.u32 2147483647, %v1588_v31  ;;  %v697_v3 = vsel %vm1629_vm9, %v1525_v21, %v693_v4  ;;  %vm709_vm15 = vweird.f32 %v1519_v2 }
 0x2dd   :  { %1156 = vrcp.f32 %v1618_v14  ;;  %v805_v22 = vand.u32 2147483648, %v1588_v31  ;;  %v701_v53 = vor.u32 1.1754944e-38, %v700_v19  ;;  %vm710_vm13 = vweird.f32 %v1566_v7 }
 0x2de   :  { %904 = vperm.xlu1 %1066, %v673_v44   ;;  %v833_v37 = vand.u32 2147483647, %v1602_v39  ;;  %v835_v8 = vand.u32 2147483648, %v1602_v39  ;;  %v713_v58 = vand.u32 2147483647, %v1519_v2  ;;  %v715_v38 = vand.u32 2147483648, %v1519_v2  ;;  %vm1690_vm9 = vmor %vm709_vm15, %vm710_vm13 }
 0x2df   :  { %1158 = vrcp.f32 %v1626_v5  ;;  %v702_v0 = vsel %vm1633_vm11, %v701_v53, %v697_v3  ;;  %v707_v9 = vmul.f32 %v1566_v7, %v706_v27  ;;  %vm799_vm8 = vweird.f32 %v1588_v31 }
 0x2e0   :  { %v1151_v55 = vpop.eup %1150  ;;  %1160 = vrcp.f32 %v1638_v49  ;;  %vm1660_vm0 = vcmp.eq.f32.partialorder %v803_v50, 8.507059e+37  ;;  %vm829_vm7 = vweird.f32 %v1602_v39  ;;  %v806_v20 = vor.u32 1.1754944e-38, %v805_v22 }
 0x2e1   :  { %v795_v21 = vmul.f32 %v1151_v55, %v1588_v31  ;;  %v1153_v15 = vpop.eup %1152  ;;  %v720_v24 = vmul.f32 %v1623_v46, %v1521_v18  ;;  %vm1670_vm10 = vcmp.eq.f32.partialorder %v833_v37, 8.507059e+37  ;;  %v836_v25 = vor.u32 1.1754944e-38, %v835_v8 }
 0x2e2   :  { %v1665_v23 = vpop.eup %1154  ;;  %v825_v29 = vmul.f32 %v1153_v15, %v1602_v39  ;;  %v703_v26 = vmul.f32 %v1420_v36, %v702_v0  ;;  %vm800_vm6 = vweird.f32 %v1151_v55  ;;  %v708_v32 = vadd.f32 %v1566_v7, %v707_v9 }
 0x2e3   :  { %v796_v6 = vsub.f32 1.0, %v795_v21  ;;  %v840_v28 = vmul.f32 %v1665_v23, %v1608_v34  ;;  %v1677_v62 = vpop.eup %1156  ;;  %vm844_vm12 = vweird.f32 %v1608_v34  ;;  %v848_v30 = vand.u32 2147483647, %v1608_v34  ;;  %vm801_vm11 = vmor %vm799_vm8, %vm800_vm6 }
 0x2e4   :  { %v826_v63 = vsub.f32 1.0, %v825_v29  ;;  %v870_v40 = vmul.f32 %v1677_v62, %v1618_v14  ;;  %vm830_vm14 = vweird.f32 %v1153_v15  ;;  %v721_v42 = vsub.f32 1.0, %v720_v24 }
 0x2e5   :  { %v797_v35 = vmul.f32 %v1151_v55, %v796_v6  ;;  %v841_v12 = vsub.f32 1.0, %v840_v28  ;;  %v1684_v41 = vpop.eup %1158  ;;  %v850_v19 = vand.u32 2147483648, %v1608_v34  ;;  %vm874_vm5 = vweird.f32 %v1618_v14  ;;  %vm831_vm13 = vmor %vm829_vm7, %vm830_vm14 }
 0x2e6   :  { %907 = vperm.xlu1 %1066, %v688_v61   ;;  %v827_v44 = vmul.f32 %v1153_v15, %v826_v63  ;;  %v1694_v4 = vpop.eup %1160  ;;  %v871_v10 = vsub.f32 1.0, %v870_v40  ;;  %vm845_vm15 = vweird.f32 %v1665_v23  ;;  %v712_v61 = vsel %vm1690_vm9, %v1566_v7, %v708_v32 }
 0x2e7   :  { %v798_v36 = vadd.f32 %v1151_v55, %v797_v35  ;;  %v842_v45 = vmul.f32 %v1665_v23, %v841_v12  ;;  %vm875_vm8 = vweird.f32 %v1677_v62  ;;  %v765_v7 = vmul.f32 %v1684_v41, %v1626_v5 }
 0x2e8   :  { %v828_v27 = vadd.f32 %v1153_v15, %v827_v44  ;;  %v872_v3 = vmul.f32 %v1677_v62, %v871_v10  ;;  %v716_v21 = vor.u32 1.1754944e-38, %v715_v38  ;;  %vm714_vm7 = vcmp.eq.f32.partialorder %v713_v58, 8.507059e+37  ;;  %vm1740_vm6 = vmor %vm874_vm5, %vm875_vm8 }
 0x2e9   :  { %v802_v16 = vsel %vm801_vm11, %v1151_v55, %v798_v36  ;;  %v843_v31 = vadd.f32 %v1665_v23, %v842_v45  ;;  %v722_v55 = vmul.f32 %v1623_v46, %v721_v42  ;;  %v1734_v34 = vperm.slane %v1576_v59, 3 }
 0x2ea   :  { %v807_v50 = vsel %vm1660_vm0, %v806_v20, %v802_v16  ;;  %v832_v53 = vsel %vm831_vm13, %v1153_v15, %v828_v27  ;;  %vm1720_vm0 = vmor %vm844_vm12, %vm845_vm15  ;;  %v873_v8 = vadd.f32 %v1677_v62, %v872_v3  ;;  %v878_v15 = vand.u32 2147483647, %v1618_v14 }
 0x2eb   :  { %v808_v22 = vmul.f32 %v1431_v47, %v807_v50  ;;  %v837_v37 = vsel %vm1670_vm10, %v836_v25, %v832_v53  ;;  %v880_v47 = vand.u32 2147483648, %v1618_v14  ;;  %v847_v9 = vsel %vm1720_vm0, %v1665_v23, %v843_v31 }
 0x2ec   :  { %v838_v0 = vmul.f32 %v1453_v54, %v837_v37  ;;  %vm849_vm10 = vcmp.eq.f32.partialorder %v848_v30, 8.507059e+37  ;;  %v851_v17 = vor.u32 1.1754944e-38, %v850_v19  ;;  %v717_v38 = vsel %vm714_vm7, %v716_v21, %v712_v61 }
 0x2ed   :  { %931 = vperm.xlu0 %1065, %v808_v22   ;;  %v877_v2 = vsel %vm1740_vm6, %v1677_v62, %v873_v8  ;;  %v723_v58 = vadd.f32 %v1623_v46, %v722_v55  ;;  %vm725_vm12 = vweird.f32 %v1623_v46  ;;  %v766_v23 = vsub.f32 1.0, %v765_v7 }
 0x2ee   :  { %910 = vperm.xlu1 %1066, %v703_v26   ;;  %937 = vperm.xlu2 %1067, %v838_v0   ;;  %v852_v6 = vsel %vm849_vm10, %v851_v17, %v847_v9  ;;  %v881_v20 = vor.u32 1.1754944e-38, %v880_v47  ;;  %v730_v29 = vand.u32 2147483648, %v1521_v18  ;;  %vm879_vm14 = vcmp.eq.f32.partialorder %v878_v15, 8.507059e+37 }
 0x2ef   :  { %v718_v14 = vmul.f32 %v1414_v33, %v717_v38  ;;  %vm724_vm5 = vweird.f32 %v1521_v18  ;;  %v728_v24 = vand.u32 2147483647, %v1521_v18  ;;  %1162 = vrcp.f32 %v1734_v34 }
 0x2f0   :  { %v882_v1 = vsel %vm879_vm14, %v881_v20, %v877_v2  ;;  %vm726_vm9 = vmor %vm724_vm5, %vm725_vm12  ;;  %v853_v25 = vmul.f32 %v1444_v51, %v852_v6  ;;  %v767_v28 = vmul.f32 %v1684_v41, %v766_v23  ;;  %v780_v62 = vmul.f32 %v1694_v4, %v1638_v49 }
 0x2f1   :  { %v727_v26 = vsel %vm726_vm9, %v1623_v46, %v723_v58  ;;  %v731_v35 = vor.u32 1.1754944e-38, %v730_v29  ;;  %v883_v33 = vmul.f32 %v1459_v57, %v882_v1  ;;  %vm729_vm11 = vcmp.eq.f32.partialorder %v728_v24, 8.507059e+37 }
 0x2f2   :  { %v626_v18 = vperm.slane %v1576_v59, 6  ;;  %v768_v32 = vadd.f32 %v1684_v41, %v767_v28  ;;  %vm770_vm15 = vweird.f32 %v1684_v41  ;;  %v781_v51 = vsub.f32 1.0, %v780_v62 }
 0x2f3   :  { %v732_v63 = vsel %vm729_vm11, %v731_v35, %v727_v26  ;;  %v775_v12 = vand.u32 2147483648, %v1626_v5  ;;  %vm769_vm13 = vweird.f32 %v1626_v5  ;;  %v773_v40 = vand.u32 2147483647, %v1626_v5 }
 0x2f4   :  { %v733_v30 = vmul.f32 %v1434_v13, %v732_v63  ;;  %1164 = vrcp.f32 %v626_v18  ;;  %vm771_vm8 = vmor %vm769_vm13, %vm770_vm15  ;;  %v782_v59 = vmul.f32 %v1694_v4, %v781_v51  ;;  %vm785_vm7 = vweird.f32 %v1694_v4 }
 0x2f5   :  { %940 = vperm.xlu0 %1065, %v853_v25   ;;  %v1163_v46 = vpop.eup %1162  ;;  %v772_v57 = vsel %vm771_vm8, %v1684_v41, %v768_v32  ;;  %v776_v44 = vor.u32 1.1754944e-38, %v775_v12  ;;  %vm774_vm0 = vcmp.eq.f32.partialorder %v773_v40, 8.507059e+37  ;;  %v790_v5 = vand.u32 2147483648, %v1638_v49 }
 0x2f6   :  { %913 = vperm.xlu1 %1066, %v718_v14   ;;  %946 = vperm.xlu2 %1067, %v883_v33   ;;  %v810_v36 = vmul.f32 %v1163_v46, %v1734_v34  ;;  %v783_v42 = vadd.f32 %v1694_v4, %v782_v59  ;;  %vm784_vm10 = vweird.f32 %v1638_v49  ;;  %v788_v41 = vand.u32 2147483647, %v1638_v49 }
 0x2f7   :  { %v777_v60 = vsel %vm774_vm0, %v776_v44, %v772_v57  ;;  %vm786_vm6 = vmor %vm784_vm10, %vm785_vm7  ;;  %v791_v61 = vor.u32 1.1754944e-38, %v790_v5  ;;  %vm815_vm14 = vweird.f32 %v1163_v46  ;;  %v820_v22 = vand.u32 2147483648, %v1734_v34 }
 0x2f8   :  { %v811_v13 = vsub.f32 1.0, %v810_v36  ;;  %v778_v19 = vmul.f32 %v1447_v52, %v777_v60  ;;  %v787_v10 = vsel %vm786_vm6, %v1694_v4, %v783_v42  ;;  %vm789_vm12 = vcmp.eq.f32.partialorder %v788_v41, 8.507059e+37 }
 0x2f9   :  { %v792_v50 = vsel %vm789_vm12, %v791_v61, %v787_v10  ;;  %vm814_vm5 = vweird.f32 %v1734_v34  ;;  %v818_v49 = vand.u32 2147483647, %v1734_v34  ;;  %v821_v55 = vor.u32 1.1754944e-38, %v820_v22 }
 0x2fa   :  { %v1165_v45 = vpop.eup %1164  ;;  %v812_v16 = vmul.f32 %v1163_v46, %v811_v13  ;;  %v793_v52 = vmul.f32 %v1441_v48, %v792_v50  ;;  %vm816_vm9 = vmor %vm814_vm5, %vm815_vm14  ;;  %v865_v39 = vand.u32 2147483648, %v626_v18  ;;  %vm859_vm13 = vweird.f32 %v626_v18 }
 0x2fb   :  { %v855_v27 = vmul.f32 %v1165_v45, %v626_v18  ;;  %vm819_vm11 = vcmp.eq.f32.partialorder %v818_v49, 8.507059e+37  ;;  %vm860_vm15 = vweird.f32 %v1165_v45  ;;  %v863_v47 = vand.u32 2147483647, %v626_v18 }
 0x2fc   :  { %v813_v31 = vadd.f32 %v1163_v46, %v812_v16  ;;  %vm861_vm8 = vmor %vm859_vm13, %vm860_vm15  ;;  %v866_v21 = vor.u32 1.1754944e-38, %v865_v39  ;;  %vm1856_vm7 = vcmask 1045509   ;;  %vm1857_vm10 = vcmask 1046534  }
 0x2fd   :  { %v856_v3 = vsub.f32 1.0, %v855_v27  ;;  %vm864_vm0 = vcmp.eq.f32.partialorder %v863_v47, 8.507059e+37  ;;  %vm1858_vm6 = vcmask 1047559   ;;  %vm1859_vm12 = vcmask 64512   ;;  %vm1861_vm14 = vmmov %vm1857_vm10 }
 0x2fe   :  { %916 = vperm.xlu1 %1066, %v733_v30   ;;  %v817_v53 = vsel %vm816_vm9, %v1163_v46, %v813_v31 }
 0x2ff   :  { %v857_v4 = vmul.f32 %v1165_v45, %v856_v3  ;;  %v822_v7 = vsel %vm819_vm11, %v821_v55, %v817_v53 }
 0x300   :  { %v823_v8 = vmul.f32 %v1456_v56, %v822_v7 }
 0x301   :  { %v858_v37 = vadd.f32 %v1165_v45, %v857_v4 }
 0x303   :  { %v862_v48 = vsel %vm861_vm8, %v1165_v45, %v858_v37 }
 0x304   :  { %v867_v0 = vsel %vm864_vm0, %v866_v21, %v862_v48 }
 0x305   :  { %v868_v9 = vmul.f32 %v1462_v43, %v867_v0 }
 0x306   :  { %925 = vperm.xlu1 %1066, %v778_v19  }
 0x30e   :  { %928 = vperm.xlu1 %1066, %v793_v52  }
 0x316   :  { %934 = vperm.xlu1 %1066, %v823_v8  }
 0x31e   :  { %943 = vperm.xlu1 %1066, %v868_v9  }
 0x334   :  { %v920_v20 = vpop.permute.xlu2 %919 }
 0x335   :  { %v954_v26 = vperm.slane %v920_v20, %v1331_v11 }
 0x348   :  { %v902_v15 = vpop.permute.xlu1 %901  ;;  %v938_v12 = vpop.permute.xlu2 %937 }
 0x349   :  { %v948_v58 = vperm.slane %v902_v15, %v1331_v11  ;;  %v960_v42 = vperm.slane %v938_v12, %v1331_v11 }
 0x34d   :  { %v923_v43 = vpop.permute.xlu0 %922 }
 0x34e   :  { %v955_v62 = vperm.slane %v923_v43, %v1331_v11 }
 0x350   :  { %v905_v34 = vpop.permute.xlu1 %904  ;;  %v947_v45 = vpop.permute.xlu2 %946 }
 0x351   :  { %v949_v2 = vperm.slane %v905_v34, %v1331_v11  ;;  %v963_v16 = vperm.slane %v947_v45, %v1331_v11 }
 0x353   :  { %v964_v29 = vsel %vm396_vm1, %v949_v2, %v948_v58 }
 0x358   :  { %v908_v17 = vpop.permute.xlu1 %907 }
 0x359   :  { %v950_v56 = vperm.slane %v908_v17, %v1331_v11 }
 0x35b   :  { %v965_v14 = vsel %vm398_vm2, %v950_v56, %v964_v29 }
 0x35f   :  { %v932_v51 = vpop.permute.xlu0 %931 }
 0x360   :  { %v911_v54 = vpop.permute.xlu1 %910  ;;  %v958_v59 = vperm.slane %v932_v51, %v1331_v11 }
 0x361   :  { %v951_v23 = vperm.slane %v911_v54, %v1331_v11 }
 0x363   :  { %v966_v1 = vsel %vm400_vm3, %v951_v23, %v965_v14 }
 0x367   :  { %v941_v13 = vpop.permute.xlu0 %940 }
 0x368   :  { %v914_v38 = vpop.permute.xlu1 %913  ;;  %v961_v19 = vperm.slane %v941_v13, %v1331_v11 }
 0x369   :  { %v952_v6 = vperm.slane %v914_v38, %v1331_v11 }
 0x36b   :  { %v967_v28 = vsel %vm402_vm4, %v952_v6, %v966_v1 }
 0x370   :  { %v917_v24 = vpop.permute.xlu1 %916 }
 0x371   :  { %v953_v25 = vperm.slane %v917_v24, %v1331_v11 }
 0x373   :  { %v968_v35 = vsel %vm1856_vm7, %v953_v25, %v967_v28 }
 0x374   :  { %v969_v33 = vsel %vm1857_vm10, %v954_v26, %v968_v35 }
 0x375   :  { %v970_v18 = vsel %vm1858_vm6, %v955_v62, %v969_v33 }
 0x376   :  { %980 = vst.msk [vmem:[%s1827_s6] sm:$0xff] %vm1859_vm12, %v970_v18 }
 0x378   :  { %v926_v63 = vpop.permute.xlu1 %925 }
 0x379   :  { %v956_v30 = vperm.slane %v926_v63, %v1331_v11 }
 0x380   :  { %v929_v32 = vpop.permute.xlu1 %928 }
 0x381   :  { %v957_v46 = vperm.slane %v929_v32, %v1331_v11 }
 0x383   :  { %v971_v40 = vsel %vm396_vm1, %v957_v46, %v956_v30  ;;  %vm1860_vm1 = vmmov %vm1856_vm7 }
 0x384   :  { %v972_v44 = vsel %vm398_vm2, %v958_v59, %v971_v40  ;;  %vm1862_vm2 = vmmov %vm1858_vm6 }
 0x388   :  { %v935_v57 = vpop.permute.xlu1 %934 }
 0x389   :  { %v959_v36 = vperm.slane %v935_v57, %v1331_v11 }
 0x38b   :  { %v973_v60 = vsel %vm400_vm3, %v959_v36, %v972_v44  ;;  %vm1863_vm3 = vmmov %vm1859_vm12 }
 0x38c   :  { %v974_v5 = vsel %vm402_vm4, %v960_v42, %v973_v60 }
 0x38d   :  { %v975_v27 = vsel %vm1860_vm1, %v961_v19, %v974_v5 }
 0x390   :  { %v944_v41 = vpop.permute.xlu1 %943 }
 0x391   :  { %v962_v10 = vperm.slane %v944_v41, %v1331_v11 }
 0x393   :  { %v976_v61 = vsel %vm1861_vm14, %v962_v10, %v975_v27 }
 0x394   :  { %v977_v50 = vsel %vm1862_vm2, %v963_v16, %v976_v61 }
 0x395   :  { %981 = vst.msk [vmem:[%s1827_s6 + $0x8] sm:$0xff] %vm1863_vm3, %v977_v50 }

</bundles_post_ra>
